<compile_context>
chip_gen: v7x
topology: tpu7x:2x2x1
jax: 0.10.0
libtpu: 0.0.40
codegen_flags: <defaults>
</compile_context>

<pallas_src>
import functools

import jax
import jax.numpy as jnp
import numpy as np
from jax import lax
from jax.experimental import pallas as pl
from jax.experimental.pallas import tpu as pltpu

_NEG = -1.0e30  # plain Python float -> stays a literal (no captured consts)


def _logaddexp(a, b):
    m = jnp.maximum(a, b)
    return m + jnp.log(jnp.exp(a - m) + jnp.exp(b - m))


def _shift_down(x, fill):   # out[t, u] = x[t-1, u], row 0 = fill
    row = jnp.full((1, x.shape[1]), fill, x.dtype)
    return jnp.concatenate([row, x[: x.shape[0] - 1, :]], axis=0)


def _shift_up(x, fill):     # out[t, u] = x[t+1, u], last row = fill
    row = jnp.full((1, x.shape[1]), fill, x.dtype)
    return jnp.concatenate([x[1:, :], row], axis=0)


def _shift_right(x, fill):  # out[t, u] = x[t, u-1], col 0 = fill
    col = jnp.full((x.shape[0], 1), fill, x.dtype)
    return jnp.concatenate([col, x[:, : x.shape[1] - 1]], axis=1)


def _shift_left(x, fill):   # out[t, u] = x[t, u+1], last col = fill
    col = jnp.full((x.shape[0], 1), fill, x.dtype)
    return jnp.concatenate([x[:, 1:], col], axis=1)


# --------------------------------------------------------------------------
# Pass 1: streaming log_softmax + blank / label gathers (V reduced away)
# --------------------------------------------------------------------------
def _logprob_kernel(labels_ref, acts_ref, blank_ref, emit_ref, *, blank):
    """labels_ref: (1, U, 1) i32; acts_ref: (1, Tt, U, V);
    blank_ref / emit_ref: (1, Tt, U) f32 outputs."""
    _, _, U, V = acts_ref.shape
    x = acts_ref[0].astype(jnp.float32)                        # (Tt, U, V)
    m = jnp.max(x, axis=-1, keepdims=True)
    lse = jnp.log(jnp.sum(jnp.exp(x - m), axis=-1, keepdims=True))
    denom = (m + lse)[:, :, 0]                                 # (Tt, U)

    # blank log-prob: static lane slice fused with the log-softmax denominator
    blank_ref[0] = (x[:, :, blank] - denom).astype(blank_ref.dtype)

    # label log-prob: one-hot(labels) built once, single multiply + V-reduce
    one_hot = labels_ref[0] == lax.broadcasted_iota(jnp.int32, (U, V), 1)
    emit_x = jnp.sum(jnp.where(one_hot[None, :, :], x, 0.0), axis=-1)
    emit_ref[0] = (emit_x - denom).astype(emit_ref.dtype)


# --------------------------------------------------------------------------
# Pass 2: alpha/beta wavefront DP on the (T, U) lattice (one batch element)
# --------------------------------------------------------------------------
def _dp_kernel(act_lens_ref, label_lens_ref, blank_ref, emit_ref,
               costs_ref, *ab_refs, with_alpha_beta):
    b = pl.program_id(0)
    _, T, U = blank_ref.shape
    blank_mat = blank_ref[0]                                   # (T, U) f32
    emit_mat = emit_ref[0]

    Tb = act_lens_ref[b]
    Ub = label_lens_ref[b] + 1

    iota_t = lax.broadcasted_iota(jnp.int32, (T, U), 0)
    iota_u = lax.broadcasted_iota(jnp.int32, (T, U), 1)
    diag = iota_t + iota_u
    valid = (iota_t < Tb) & (iota_u < Ub)
    neg = jnp.full_like(blank_mat, _NEG)

    # loop-invariant shifted prob matrices for the alpha recursion:
    #   alpha[t,u] = logaddexp(alpha[t-1,u] + blank[t-1,u],
    #                          alpha[t,u-1] + emit[t,u-1])
    blank_down = _shift_down(blank_mat, 0.0)    # blank[t-1, u]
    emit_right = _shift_right(emit_mat, 0.0)    # emit[t, u-1]

    alpha0 = jnp.where((iota_t == 0) & (iota_u == 0),
                       jnp.zeros_like(blank_mat), neg)

    def alpha_body(d, alpha):
        a_top = _shift_down(alpha, _NEG) + blank_down
        a_left = _shift_right(alpha, _NEG) + emit_right
        return jnp.where(diag == d, _logaddexp(a_top, a_left), alpha)

    # TODO(synk): further speedup possible by carrying only anti-diagonal
    #             vectors instead of the full (T, U) lattice per step.
    alpha = lax.fori_loop(1, T + U - 1, alpha_body, alpha0)

    final_mask = (iota_t == Tb - 1) & (iota_u == Ub - 1)
    ll = jnp.sum(jnp.sum(jnp.where(final_mask, alpha + blank_mat, 0.0),
                         axis=1, keepdims=True), axis=0, keepdims=True)  # (1,1)
    costs_ref[0] = (-ll).astype(costs_ref.dtype)

    if with_alpha_beta:
        alphas_ref, betas_ref = ab_refs
        alphas_ref[0] = jnp.where(valid, alpha, 0.0).astype(alphas_ref.dtype)

        beta0 = jnp.where(final_mask, blank_mat, neg)
        rdiag = (Tb - 1 - iota_t) + (Ub - 1 - iota_u)

        def beta_body(s, beta):
            below = _shift_up(beta, _NEG)
            right = _shift_left(beta, _NEG)
            t1 = jnp.where(iota_t < Tb - 1, below + blank_mat, _NEG)
            t2 = jnp.where(iota_u < Ub - 1, right + emit_mat, _NEG)
            return jnp.where((rdiag == s) & valid, _logaddexp(t1, t2), beta)

        beta = lax.fori_loop(1, T + U - 1, beta_body, beta0)
        betas_ref[0] = jnp.where(valid, beta, 0.0).astype(betas_ref.dtype)


# --------------------------------------------------------------------------
# Wrapper (mirrors _RNNT.forward semantics)
# --------------------------------------------------------------------------
def _pick_t_tile(T, U, V, itemsize, budget_bytes=12 * 1024 * 1024):
    """Largest legal T-tile (divisor of T, multiple of 8 or == T) under budget."""
    if T * U * V * itemsize <= budget_bytes:
        return T
    divs = [d for d in range(8, T, 8) if T % d == 0]
    fitting = [d for d in divs if d * U * V * itemsize <= budget_bytes]
    if fitting:
        return max(fitting)
    if divs:
        return min(divs)
    return T  # no legal sub-tile; fall back to the full T


def rnnt_loss(acts, labels, act_lens, label_lens, *, blank=0,
              reduction='mean', return_alpha_beta=False):
    """JAX/Pallas equivalent of RNNTLoss.forward (forward pass only)."""
    assert acts.ndim == 4 and labels.ndim == 2
    assert act_lens.ndim == 1 and label_lens.ndim == 1
    B, T, U, V = acts.shape
    labels = labels.astype(jnp.int32)
    act_lens = act_lens.astype(jnp.int32)
    label_lens = label_lens.astype(jnp.int32)

    # ---------------- pass 1 ----------------
    t_tile = _pick_t_tile(T, U, V, jnp.dtype(acts.dtype).itemsize)
    n_t = T // t_tile

    pad_w = max(U - labels.shape[1], 0)
    labels3 = jnp.concatenate(
        [labels, jnp.zeros((B, pad_w), jnp.int32)], axis=1)[:, :U].reshape(B, U, 1)

    blank_lp, emit_lp = pl.pallas_call(
        functools.partial(_logprob_kernel, blank=blank),
        out_shape=(jax.ShapeDtypeStruct((B, T, U), jnp.float32),
                   jax.ShapeDtypeStruct((B, T, U), jnp.float32)),
        grid=(B, n_t),
        in_specs=[
            pl.BlockSpec((1, U, 1), lambda b, t: (b, 0, 0)),             # labels
            pl.BlockSpec((1, t_tile, U, V), lambda b, t: (b, t, 0, 0)),  # acts
        ],
        out_specs=(
            pl.BlockSpec((1, t_tile, U), lambda b, t: (b, t, 0)),
            pl.BlockSpec((1, t_tile, U), lambda b, t: (b, t, 0)),
        ),
        compiler_params=pltpu.CompilerParams(
            dimension_semantics=("parallel", "parallel"),
            vmem_limit_bytes=32 * 1024 * 1024),
    )(labels3, acts)

    # ---------------- pass 2 ----------------
    out_shape = [jax.ShapeDtypeStruct((B, 1, 1), acts.dtype)]
    out_specs = [pl.BlockSpec((1, 1, 1), lambda b, al, ll: (b, 0, 0))]
    if return_alpha_beta:
        out_shape += [jax.ShapeDtypeStruct((B, T, U), acts.dtype)] * 2
        out_specs += [pl.BlockSpec((1, T, U), lambda b, al, ll: (b, 0, 0))] * 2

    grid_spec = pltpu.PrefetchScalarGridSpec(
        num_scalar_prefetch=2,
        grid=(B,),
        in_specs=[pl.BlockSpec((1, T, U), lambda b, al, ll: (b, 0, 0)),
                  pl.BlockSpec((1, T, U), lambda b, al, ll: (b, 0, 0))],
        out_specs=tuple(out_specs))

    outs = pl.pallas_call(
        functools.partial(_dp_kernel, with_alpha_beta=return_alpha_beta),
        out_shape=tuple(out_shape),
        grid_spec=grid_spec,
        compiler_params=pltpu.CompilerParams(
            dimension_semantics=("parallel",)),
    )(act_lens, label_lens, blank_lp, emit_lp)

    costs = outs[0].reshape(B)
    if reduction in ('sum', 'mean'):
        costs = jnp.sum(costs, keepdims=True)                  # (1,)
        if reduction == 'mean':
            costs = costs / B

    if return_alpha_beta:
        return costs, outs[1], outs[2]
    return costs


# --------------------------------------------------------------------------
# Pure-numpy reference for validation
# --------------------------------------------------------------------------
def _reference_rnnt(acts, labels, act_lens, label_lens, blank=0):
    acts = np.asarray(acts, dtype=np.float64)
    labels = np.asarray(labels)
    act_lens = np.asarray(act_lens)
    label_lens = np.asarray(label_lens)
    B, T, U, V = acts.shape
    mx = acts.max(-1, keepdims=True)
    lp = acts - mx - np.log(np.exp(acts - mx).sum(-1, keepdims=True))
    costs = np.zeros(B)
    for b in range(B):
        Tb = int(act_lens[b]); Ub = int(label_lens[b]) + 1
        alpha = np.full((Tb, Ub), -np.inf)
        alpha[0, 0] = 0.0
        for t in range(Tb):
            for u in range(Ub):
                if t == 0 and u == 0:
                    continue
                a = alpha[t - 1, u] + lp[b, t - 1, u, blank] if t > 0 else -np.inf
                c = (alpha[t, u - 1] + lp[b, t, u - 1, labels[b, u - 1]]
                     if u > 0 else -np.inf)
                alpha[t, u] = np.logaddexp(a, c)
        costs[b] = -(alpha[Tb - 1, Ub - 1] + lp[b, Tb - 1, Ub - 1, blank])
    return costs


if __name__ == "__main__":
    key = jax.random.PRNGKey(0)
    B, T, U, V = 2, 4, 3, 5           # U = max(label_lens) + 1, T = max(act_lens)
    acts = jax.random.normal(key, (B, T, U, V), dtype=jnp.float32)
    labels = jnp.array([[1, 2], [3, 0]], dtype=jnp.int32)     # zero padded
    act_lens = jnp.array([4, 3], dtype=jnp.int32)
    label_lens = jnp.array([2, 1], dtype=jnp.int32)

    # per-example costs + alphas/betas (return_alpha_beta=True path)
    costs, alphas, betas = rnnt_loss(acts, labels, act_lens, label_lens,
                                     blank=0, reduction='none',
                                     return_alpha_beta=True)
    # reduced loss only (alpha/beta writeback skipped inside the kernel)
    mean_cost = rnnt_loss(acts, labels, act_lens, label_lens,
                          blank=0, reduction='mean')
    costs, alphas, betas, mean_cost = jax.block_until_ready(
        (costs, alphas, betas, mean_cost))

    ref_costs = _reference_rnnt(np.asarray(acts), np.asarray(labels),
                                np.asarray(act_lens), np.asarray(label_lens),
                                blank=0)

    assert costs.shape == (B,) and alphas.shape == (B, T, U)
    assert betas.shape == (B, T, U) and mean_cost.shape == (1,)
    np.testing.assert_allclose(np.asarray(costs), ref_costs,
                               rtol=1e-4, atol=1e-3)
    # beta[b, 0, 0] is the per-example log-likelihood, i.e. -cost.
    np.testing.assert_allclose(np.asarray(betas)[:, 0, 0], -ref_costs,
                               rtol=1e-4, atol=1e-3)
    assert abs(float(mean_cost[0]) - float(ref_costs.mean())) < 1e-3

    print("KERNEL_OK")
</pallas_src>

<mosaic_0001>
module attributes {stable_mosaic.version = 11 : i64} {
  func.func @_logprob_kernel(%arg0: i32, %arg1: i32, %arg2: memref<1x3x1xi32, #tpu.memory_space<vmem>>, %arg3: memref<1x4x3x5xf32, #tpu.memory_space<vmem>>, %arg4: memref<1x4x3xf32, #tpu.memory_space<vmem>>, %arg5: memref<1x4x3xf32, #tpu.memory_space<vmem>>) attributes {dimension_semantics = [#tpu.dimension_semantics<parallel>, #tpu.dimension_semantics<parallel>], iteration_bounds = array<i64: 2, 1>, scalar_prefetch = 0 : i64, scratch_operands = 0 : i64, tpu.core_type = #tpu.core_type<tc>, window_params = [{transform_indices = @transform_0, window_bounds = array<i64: 1, 3, 1>}, {transform_indices = @transform_1, window_bounds = array<i64: 1, 4, 3, 5>}, {transform_indices = @transform_2, window_bounds = array<i64: 1, 4, 3>}, {transform_indices = @transform_3, window_bounds = array<i64: 1, 4, 3>}]} {
    %c0 = arith.constant 0 : index
    %c0_0 = arith.constant 0 : index
    %c0_1 = arith.constant 0 : index
    %c0_2 = arith.constant 0 : index
    %0 = vector.load %arg3[%c0, %c0_0, %c0_1, %c0_2] : memref<1x4x3x5xf32, #tpu.memory_space<vmem>>, vector<1x4x3x5xf32>
    %1 = vector.shape_cast %0 : vector<1x4x3x5xf32> to vector<4x3x5xf32>
    %cst = arith.constant dense<0xFF800000> : vector<4x3xf32>
    %2 = vector.multi_reduction <maximumf>, %1, %cst [2] : vector<4x3x5xf32> to vector<4x3xf32>
    %3 = vector.shape_cast %2 : vector<4x3xf32> to vector<4x3x1xf32>
    %4 = vector.broadcast %3 : vector<4x3x1xf32> to vector<4x3x5xf32>
    %5 = arith.subf %1, %4 : vector<4x3x5xf32>
    %6 = math.exp %5 : vector<4x3x5xf32>
    %cst_3 = arith.constant dense<0.000000e+00> : vector<4x3xf32>
    %7 = vector.multi_reduction <add>, %6, %cst_3 [2] : vector<4x3x5xf32> to vector<4x3xf32>
    %8 = vector.shape_cast %7 : vector<4x3xf32> to vector<4x3x1xf32>
    %9 = math.log %8 : vector<4x3x1xf32>
    %10 = arith.addf %3, %9 : vector<4x3x1xf32>
    %11 = vector.shape_cast %10 : vector<4x3x1xf32> to vector<4x3xf32>
    %12 = vector.extract_strided_slice %1 {offsets = [0, 0, 0], sizes = [4, 3, 1], strides = [1, 1, 1]} : vector<4x3x5xf32> to vector<4x3x1xf32>
    %13 = vector.shape_cast %12 : vector<4x3x1xf32> to vector<4x3xf32>
    %14 = arith.subf %13, %11 : vector<4x3xf32>
    %c0_4 = arith.constant 0 : index
    %c0_5 = arith.constant 0 : index
    %c0_6 = arith.constant 0 : index
    %15 = vector.load %arg4[%c0_4, %c0_5, %c0_6] : memref<1x4x3xf32, #tpu.memory_space<vmem>>, vector<1x4x3xf32>
    %16 = vector.shape_cast %15 : vector<1x4x3xf32> to vector<4x3xf32>
    %17 = vector.shape_cast %14 : vector<4x3xf32> to vector<1x4x3xf32>
    tpu.vector_store %arg4[%c0_4, %c0_5, %c0_6], %17 {strides = array<i32>} : memref<1x4x3xf32, #tpu.memory_space<vmem>>, vector<1x4x3xf32>,
    %c0_7 = arith.constant 0 : index
    %c0_8 = arith.constant 0 : index
    %c0_9 = arith.constant 0 : index
    %18 = vector.load %arg2[%c0_7, %c0_8, %c0_9] : memref<1x3x1xi32, #tpu.memory_space<vmem>>, vector<1x3x1xi32>
    %19 = vector.shape_cast %18 : vector<1x3x1xi32> to vector<3x1xi32>
    %20 = tpu.iota {dimensions = array<i32: 1>} : vector<3x5xi32>
    %21 = vector.broadcast %19 : vector<3x1xi32> to vector<3x5xi32>
    %22 = arith.cmpi eq, %21, %20 : vector<3x5xi32>
    %23 = vector.shape_cast %22 : vector<3x5xi1> to vector<1x3x5xi1>
    %cst_10 = arith.constant 0.000000e+00 : f32
    %24 = vector.shape_cast %23 : vector<1x3x5xi1> to vector<1x3x5xi1>
    %25 = vector.broadcast %24 : vector<1x3x5xi1> to vector<4x3x5xi1>
    %26 = vector.broadcast %cst_10 : f32 to vector<4x3x5xf32>
    %27 = arith.select %25, %1, %26 : vector<4x3x5xi1>, vector<4x3x5xf32>
    %cst_11 = arith.constant dense<0.000000e+00> : vector<4x3xf32>
    %28 = vector.multi_reduction <add>, %27, %cst_11 [2] : vector<4x3x5xf32> to vector<4x3xf32>
    %29 = arith.subf %28, %11 : vector<4x3xf32>
    %c0_12 = arith.constant 0 : index
    %c0_13 = arith.constant 0 : index
    %c0_14 = arith.constant 0 : index
    %30 = vector.load %arg5[%c0_12, %c0_13, %c0_14] : memref<1x4x3xf32, #tpu.memory_space<vmem>>, vector<1x4x3xf32>
    %31 = vector.shape_cast %30 : vector<1x4x3xf32> to vector<4x3xf32>
    %32 = vector.shape_cast %29 : vector<4x3xf32> to vector<1x4x3xf32>
    tpu.vector_store %arg5[%c0_12, %c0_13, %c0_14], %32 {strides = array<i32>} : memref<1x4x3xf32, #tpu.memory_space<vmem>>, vector<1x4x3xf32>,
    return
  }
  func.func @transform_0(%arg0: i32, %arg1: i32) -> (i32, i32, i32) {
    %c0_i32 = arith.constant 0 : i32
    %c0_i32_0 = arith.constant 0 : i32
    %c0_i32_1 = arith.constant 0 : i32
    return %arg0, %c0_i32, %c0_i32_0 : i32, i32, i32
  }
  func.func @transform_1(%arg0: i32, %arg1: i32) -> (i32, i32, i32, i32) {
    %c0_i32 = arith.constant 0 : i32
    %c0_i32_0 = arith.constant 0 : i32
    %c0_i32_1 = arith.constant 0 : i32
    return %arg0, %arg1, %c0_i32, %c0_i32_0 : i32, i32, i32, i32
  }
  func.func @transform_2(%arg0: i32, %arg1: i32) -> (i32, i32, i32) {
    %c0_i32 = arith.constant 0 : i32
    %c0_i32_0 = arith.constant 0 : i32
    return %arg0, %arg1, %c0_i32 : i32, i32, i32
  }
  func.func @transform_3(%arg0: i32, %arg1: i32) -> (i32, i32, i32) {
    %c0_i32 = arith.constant 0 : i32
    %c0_i32_0 = arith.constant 0 : i32
    return %arg0, %arg1, %c0_i32 : i32, i32, i32
  }
}

</mosaic_0001>

<bundles_post_ra>
// kernel: tpu_custom_call.1
= control target key start
LH: loop header
LB: loop body
LE: loop exit
PB: predicated region body
PF: predicated region fallthrough
CT: control target
= control target key end

     0   :  { %s624_s12 = smov 0   ;;  %s626_s13 = smov 0   ;;  %s724_s0 = inlined_call_operand.vmem [shape: s32[2,3,1], index: 0, kind: input, shape index: {}]   ;;  %s725_s1 = inlined_call_operand.vmem [shape: f32[2,4,3,5], index: 1, kind: input, shape index: {}]   ;;  %s726_s2 = inlined_call_operand.vmem [shape: f32[2,4,3], index: 2, kind: output, shape index: {0}]   ;;  %s727_s3 = inlined_call_operand.vmem [shape: f32[2,4,3], index: 3, kind: output, shape index: {1}]  }
   0x1   :  { %s628_s14 = smov 0  }
   0x2 LB: > { %s26_s15 = sadd.s32 1, %s597_s13  ;;  %p527_p0 = scmp.ge.s32.totalorder %s601_s14, 1  ;;  %s601_s14 = sphi %s628_s14, %s14_s14   ;;  %s597_s13 = sphi %s626_s13, %s729_s13   ;;  %s593_s12 = sphi %s624_s12, %s728_s12  }
   0x3   : > { %p28_p1 = scmp.ge.s32.totalorder %s26_s15, 2  ;;  %p172_p2 = scmp.lt.s32.totalorder %s601_s14, 3 }
   0x5   : > { %s731_s15 = smov (%p28_p1, %s26_s15), 0  ;;  %p173_p3 = pnand %p527_p0, %p172_p2 }
   0x6   : > { %p213_p4 = scmp.lt.s32.totalorder (!%p173_p3), %s593_s12, 1  ;;  %vm245_vm0 = vcmask (!%p173_p3), 34816   ;;  %v603_v8 = vmov (!%p173_p3), 0   ;;  %v314_v31 = vlaneseq (!%p173_p3)  ;;  %vm332_vm2 = vcmask (!%p173_p3), 1041409  }
   0x7   : > { %176 = sbr.rel (%p173_p3) target bundleno = 508 (0x1fc), region = 28  ;;  %561 = vset.pattern.permute.xlu0 (!%p173_p3), %v603_v8  ;;  %562 = vset.pattern.permute.xlu1 (!%p173_p3), %v603_v8  ;;  %vm334_vm3 = vcmask (!%p173_p3), 1042434   ;;  %vm336_vm4 = vcmask (!%p173_p3), 1043459   ;;  %vm339_vm5 = vcmask (!%p173_p3), 19456  }
   0x8   : > { %v315_v33 = vand.u32 (!%p173_p3), 127, %v314_v31  ;;  %v317_v63 = vshrl.u32 (!%p173_p3), %v314_v31, 7 }
   0xe   : > { %s733_s12 = smov (!%p213_p4, %s593_s12), 1 }
   0xf   : > { %s535_s16 = sshll.u32 %s733_s12, 4  ;;  %s679_s20 = sshll.u32 %s733_s12, 2 }
  0x10   : > { %s225_s19 = scalar_lea.vmem %s725_s1, %s535_s16  ;;  %s216_s23 = scalar_lea.vmem %s724_s0, %s679_s20 }
  0x11   : > { %v648_v0 = vld [vmem:[%s225_s19] sm:$0x7]  ;;  %v650_v1 = vld [vmem:[%s225_s19 + $0x8] sm:$0x7]  ;;  %v652_v2 = vld [vmem:[%s225_s19 + $0x4] sm:$0x7]  ;;  %s240_s26 = scalar_lea.vmem %s727_s3, %s679_s20  ;;  %s233_s29 = scalar_lea.vmem %s726_s2, %s679_s20 }
  0x12   : > { %v246_v3 = vsel %vm245_vm0, %v648_v0, -inf  ;;  %v252_v4 = vsel %vm245_vm0, %v650_v1, -inf  ;;  %v658_v5 = vld [vmem:[%s225_s19 + $0xc] sm:$0x7]  ;;  %v249_v6 = vsel %vm245_vm0, %v652_v2, -inf }
  0x13   : > { %247 = vmax.xlane.f32.xlu0 %v246_v3  ;;  %253 = vmax.xlane.f32.xlu1 %v252_v4  ;;  %v255_v7 = vsel %vm245_vm0, %v658_v5, -inf  ;;  %v341_v29 = vld [vmem:[%s216_s23] sm:$0x7]  ;;  %v318_v4 = vsub.s32 %v315_v33, %v317_v63 }
  0x17   : > { %250 = vmax.xlane.f32.xlu0 %v249_v6  ;;  %256 = vmax.xlane.f32.xlu1 %v255_v7 }
  0xa0   : > { %v248_v9 = vpop.xlane.xlu0 %247  ;;  %v664_v10 = vpop.xlane.xlu1 %253 }
  0xa1   : > { %v258_v11 = vsub.f32 %v648_v0, %v248_v9  ;;  %v260_v12 = vsub.f32 %v650_v1, %v664_v10 }
  0xa3   : > { %v262_v13 = vmul.f32 1.442695, %v258_v11  ;;  %v266_v14 = vmul.f32 1.442695, %v260_v12 }
  0xa4   : > { %v251_v15 = vpop.xlane.xlu0 %250  ;;  %v669_v16 = vpop.xlane.xlu1 %256 }
  0xa5   : > { %563 = vpow2.f32 %v262_v13  ;;  %v259_v17 = vsub.f32 %v652_v2, %v251_v15  ;;  %v261_v18 = vsub.f32 %v658_v5, %v669_v16 }
  0xa6   : > { %565 = vpow2.f32 %v266_v14 }
  0xa7   : > { %v264_v19 = vmul.f32 1.442695, %v259_v17  ;;  %v268_v20 = vmul.f32 1.442695, %v261_v18 }
  0xa9   : > { %567 = vpow2.f32 %v264_v19 }
  0xaa   : > { %569 = vpow2.f32 %v268_v20 }
  0xaf   : > { %v564_v21 = vpop.eup %563 }
  0xb0   : > { %v566_v22 = vpop.eup %565  ;;  %v270_v23 = vsel %vm245_vm0, %v564_v21, 0.0 }
  0xb1   : > { %271 = vadd.xlane.f32.xlu0 %v270_v23  ;;  %v276_v24 = vsel %vm245_vm0, %v566_v22, 0.0 }
  0xb3   : > { %v568_v25 = vpop.eup %567 }
  0xb4   : > { %v570_v26 = vpop.eup %569  ;;  %v273_v27 = vsel %vm245_vm0, %v568_v25, 0.0 }
  0xb5   : > { %277 = vadd.xlane.f32.xlu0 %v276_v24  ;;  %274 = vadd.xlane.f32.xlu1 %v273_v27  ;;  %v279_v28 = vsel %vm245_vm0, %v570_v26, 0.0 }
  0xb9   : > { %280 = vadd.xlane.f32.xlu1 %v279_v28 }
  0xcb   : > { %343 = vperm.xlu0 %561, %v341_v29  }
 0x13e   : > { %v272_v30 = vpop.xlane.xlu0 %271 }
 0x13f   : > { %571 = vlog2.f32 %v272_v30 }
 0x142   : > { %v278_v32 = vpop.xlane.xlu0 %277  ;;  %v275_v40 = vpop.xlane.xlu1 %274 }
 0x143   : > { %573 = vlog2.f32 %v275_v40 }
 0x144   : > { %575 = vlog2.f32 %v278_v32 }
 0x146   : > { %v281_v44 = vpop.xlane.xlu1 %280 }
 0x147   : > { %577 = vlog2.f32 %v281_v44 }
 0x149   : > { %v572_v45 = vpop.eup %571 }
 0x14a   : > { %v344_v34 = vpop.permute.xlu0 %343  ;;  %v283_v46 = vmul.f32 0.6931472, %v572_v45 }
 0x14b   : > { %vm345_vm1 = vcmp.eq.s32.totalorder %v344_v34, %v315_v33 }
 0x14c   : > { %v348_v35 = vsel %vm345_vm1, %v648_v0, 0.0  ;;  %v349_v37 = vsel %vm345_vm1, %v652_v2, 0.0  ;;  %v350_v39 = vsel %vm345_vm1, %v650_v1, 0.0  ;;  %v351_v42 = vsel %vm345_vm1, %v658_v5, 0.0 }
 0x14d   : > { %v352_v36 = vsel %vm245_vm0, %v348_v35, 0.0  ;;  %v355_v38 = vsel %vm245_vm0, %v349_v37, 0.0  ;;  %v358_v41 = vsel %vm245_vm0, %v350_v39, 0.0  ;;  %v361_v43 = vsel %vm245_vm0, %v351_v42, 0.0  ;;  %v574_v47 = vpop.eup %573 }
 0x14e   : > { %353 = vadd.xlane.f32.xlu1 %v352_v36  ;;  %v290_v48 = vadd.f32 %v283_v46, %v248_v9  ;;  %v285_v49 = vmul.f32 0.6931472, %v574_v47  ;;  %v576_v50 = vpop.eup %575 }
 0x14f   : > { %v287_v52 = vmul.f32 0.6931472, %v576_v50 }
 0x150   : > { %v291_v51 = vadd.f32 %v285_v49, %v251_v15  ;;  %v294_v53 = vsub.f32 %v648_v0, %v290_v48 }
 0x151   : > { %v578_v54 = vpop.eup %577  ;;  %v292_v55 = vadd.f32 %v287_v52, %v664_v10 }
 0x152   : > { %356 = vadd.xlane.f32.xlu1 %v355_v38  ;;  %v289_v56 = vmul.f32 0.6931472, %v578_v54  ;;  %v295_v57 = vsub.f32 %v652_v2, %v291_v51 }
 0x153   : > { %v296_v59 = vsub.f32 %v650_v1, %v292_v55 }
 0x154   : > { %v293_v58 = vadd.f32 %v289_v56, %v669_v16 }
 0x156   : > { %359 = vadd.xlane.f32.xlu1 %v358_v41  ;;  %v297_v60 = vsub.f32 %v658_v5, %v293_v58 }
 0x15a   : > { %362 = vadd.xlane.f32.xlu1 %v361_v43 }
 0x16b   : > { %303 = vperm.xlu1 %562, %v294_v53  }
 0x16f   : > { %306 = vperm.xlu1 %562, %v295_v57  }
 0x173   : > { %309 = vperm.xlu1 %562, %v296_v59  }
 0x177   : > { %312 = vperm.xlu1 %562, %v297_v60  }
 0x1db   : > { %v354_v61 = vpop.xlane.xlu1 %353 }
 0x1dc   : > { %v364_v6 = vsub.f32 %v354_v61, %v290_v48 }
 0x1de   : > { %v375_v10 = vrot.slane %v364_v6, %v318_v4 }
 0x1df   : > { %v357_v62 = vpop.xlane.xlu1 %356 }
 0x1e0   : > { %v365_v0 = vsub.f32 %v357_v62, %v291_v51 }
 0x1e2   : > { %v379_v8 = vrot.slane %v365_v0, %v318_v4 }
 0x1e3   : > { %v360_v3 = vpop.xlane.xlu1 %359 }
 0x1e4   : > { %v366_v7 = vsub.f32 %v360_v3, %v292_v55  ;;  %v388_v5 = vsel %vm332_vm2, %v379_v8, %v375_v10 }
 0x1e6   : > { %v383_v2 = vrot.slane %v366_v7, %v318_v4 }
 0x1e7   : > { %v363_v9 = vpop.xlane.xlu1 %362 }
 0x1e8   : > { %v367_v1 = vsub.f32 %v363_v9, %v293_v58  ;;  %v389_v12 = vsel %vm334_vm3, %v383_v2, %v388_v5 }
 0x1ea   : > { %v387_v11 = vrot.slane %v367_v1, %v318_v4 }
 0x1eb   : > { %v304_v13 = vpop.permute.xlu1 %303 }
 0x1ec   : > { %v390_v14 = vsel %vm336_vm4, %v387_v11, %v389_v12  ;;  %v319_v19 = vrot.slane %v304_v13, %v318_v4 }
 0x1ed   : > { %392 = vst.msk [vmem:[%s240_s26] sm:$0xf] %vm339_vm5, %v390_v14 }
 0x1ef   : > { %v307_v15 = vpop.permute.xlu1 %306 }
 0x1f0   : > { %v323_v17 = vrot.slane %v307_v15, %v318_v4 }
 0x1f2   : > { %v333_v21 = vsel %vm332_vm2, %v323_v17, %v319_v19 }
 0x1f3   : > { %v310_v16 = vpop.permute.xlu1 %309 }
 0x1f4   : > { %v327_v18 = vrot.slane %v310_v16, %v318_v4 }
 0x1f6   : > { %v335_v23 = vsel %vm334_vm3, %v327_v18, %v333_v21 }
 0x1f7   : > { %v313_v20 = vpop.permute.xlu1 %312 }
 0x1f8   : > { %v331_v22 = vrot.slane %v313_v20, %v318_v4 }
 0x1fa   : > { %v337_v24 = vsel %vm336_vm4, %v331_v22, %v335_v23 }
 0x1fb   : > { %340 = vst.msk [vmem:[%s233_s29] sm:$0xf] %vm339_vm5, %v337_v24 }
 0x1fc PF: > { %s14_s14 = sadd.s32 1, %s601_s14   ;;  %s728_s12 = smov %s597_s13 }
 0x1fd   : > { %p11_p5 = scmp.ge.s32.totalorder %s14_s14, 4   ;;  %s729_s13 = smov %s731_s15 }
 0x1ff   :  { %13 = sbr.rel (!%p11_p5) target bundleno = 2 (0x2), region = 73 }

</bundles_post_ra>
